<compile_context>
chip_gen: v5e
topology: v5e:2x2
jax: 0.10.0
libtpu: 0.0.40
codegen_flags: <defaults>
</compile_context>

<pallas_src>
import functools
import numpy as np
import jax
import jax.numpy as jnp
from jax.experimental import pallas as pl
from jax.experimental.pallas import tpu as pltpu


# ----------------------------------------------------------------------------
# Kernel: one (batch, query-tile) block of multi-head attention.
# ----------------------------------------------------------------------------
def _mha_kernel(q_ref, k_ref, v_ref, mask_ref,
                wq_ref, bq_ref, wk_ref, bk_ref, wv_ref, bv_ref,
                wo_ref, bo_ref,
                out_ref, *, n_heads, d_k, d_v):
    f32 = jnp.float32
    bf16 = jnp.bfloat16
    TQ = q_ref.shape[0]          # query tile length
    S = k_ref.shape[0]           # key/value sequence length

    # ---- fused Q/K/V projections: full-width MXU matmuls (bf16 in, f32 acc) ----
    xq = q_ref[...].astype(bf16)
    xk = k_ref[...].astype(bf16)
    xv = v_ref[...].astype(bf16)

    scale = f32(1.0 / float(np.sqrt(d_k)))
    # fold the 1/sqrt(d_k) scale into Q (cheaper than scaling (H, TQ, S) scores)
    Q = (jnp.dot(xq, wq_ref[...], preferred_element_type=f32) + bq_ref[...]) * scale
    K = jnp.dot(xk, wk_ref[...], preferred_element_type=f32) + bk_ref[...]
    V = jnp.dot(xv, wv_ref[...], preferred_element_type=f32) + bv_ref[...]

    # ---- move heads to a leading batch axis (no per-head lane slicing) ----
    Qh = pltpu.einshape("qhd->hqd", Q.reshape(TQ, n_heads, d_k))   # (H, TQ, d_k)
    Kh = pltpu.einshape("khd->hkd", K.reshape(S, n_heads, d_k))    # (H, S,  d_k)
    Vh = pltpu.einshape("khd->hkd", V.reshape(S, n_heads, d_v))    # (H, S,  d_v)

    # ---- scores: one batched matmul over all heads ----
    scores = jnp.einsum("hqd,hkd->hqk",
                        Qh.astype(bf16), Kh.astype(bf16),
                        preferred_element_type=f32)                # (H, TQ, S) f32

    # additive mask bias computed once per block (1.0 == masked -> -1e9)
    bias = jnp.where(mask_ref[...] > 0.5, f32(-1e9), f32(0.0))     # (TQ, S)
    scores = scores + bias[None, :, :]

    # ---- softmax in f32 (max-subtracted), EUP approx reciprocal ----
    scores = scores - jnp.max(scores, axis=-1, keepdims=True)
    p = jnp.exp(scores)
    p = p * pl.reciprocal(jnp.sum(p, axis=-1, keepdims=True), approx=True)
    # TODO(synk): attention dropout (p=0.1) is identity here (inference/eval mode).

    # ---- context: one batched matmul over all heads ----
    ctx = jnp.einsum("hqk,hkd->hqd",
                     p.astype(bf16), Vh.astype(bf16),
                     preferred_element_type=f32)                   # (H, TQ, d_v)

    # ---- single fused output projection over the concatenated heads ----
    ctx = pltpu.einshape("hqd->qhd", ctx).reshape(TQ, n_heads * d_v)
    out = jnp.dot(ctx.astype(bf16), wo_ref[...],
                  preferred_element_type=f32) + bo_ref[...]
    out_ref[...] = out.astype(out_ref.dtype)


# ----------------------------------------------------------------------------
# Wrapper
# ----------------------------------------------------------------------------
def multi_head_attention(q, k, v, mask, params, *, n_heads, d_k, d_v, q_tile=128):
    """q: (B, Sq, D), k/v: (B, Skv, D), mask: (B, Sq, Skv) f32 (1.0 = masked)."""
    B, Sq, D = q.shape
    Skv = k.shape[1]
    TQ = min(q_tile, Sq)
    assert Sq % TQ == 0, "Sq must be divisible by the query tile"
    n_q = Sq // TQ

    kernel = functools.partial(_mha_kernel, n_heads=n_heads, d_k=d_k, d_v=d_v)

    bf16 = jnp.bfloat16
    # MXU operands in bf16 (halves weight HBM/VMEM bytes); biases stay f32.
    wq = params["wq"].astype(bf16)
    wk = params["wk"].astype(bf16)
    wv = params["wv"].astype(bf16)
    wo = params["wo"].astype(bf16)
    bq, bk, bv, bo = params["bq"], params["bk"], params["bv"], params["bo"]
    weights = [wq, bq, wk, bk, wv, bv, wo, bo]

    def full(arr):
        nd = arr.ndim
        return pl.BlockSpec(arr.shape, lambda b, qi, _n=nd: (0,) * _n)

    return pl.pallas_call(
        kernel,
        out_shape=jax.ShapeDtypeStruct((B, Sq, D), jnp.float32),
        grid_spec=pltpu.PrefetchScalarGridSpec(
            num_scalar_prefetch=0,
            grid=(B, n_q),
            in_specs=[
                pl.BlockSpec((None, TQ, D), lambda b, qi: (b, qi, 0)),    # q tile
                pl.BlockSpec((None, Skv, D), lambda b, qi: (b, 0, 0)),    # k (full)
                pl.BlockSpec((None, Skv, D), lambda b, qi: (b, 0, 0)),    # v (full)
                pl.BlockSpec((None, TQ, Skv), lambda b, qi: (b, qi, 0)),  # mask tile
            ] + [full(w) for w in weights],
            out_specs=pl.BlockSpec((None, TQ, D), lambda b, qi: (b, qi, 0)),
        ),
        compiler_params=pltpu.CompilerParams(
            dimension_semantics=("parallel", "parallel"),
            vmem_limit_bytes=64 * 1024 * 1024),
    )(q, k, v, mask, *weights)


# ----------------------------------------------------------------------------
# Deterministic parameter init (xavier-uniform projections, zero biases),
# matching the PyTorch module's init intent. out_proj weight is stored
# pre-transposed as (H*d_v, d_model) so the kernel does a plain x @ W + b.
# ----------------------------------------------------------------------------
def xavier(key, fan_in, fan_out):
    limit = float(np.sqrt(6.0 / (fan_in + fan_out)))
    return jax.random.uniform(key, (fan_in, fan_out), jnp.float32, -limit, limit)


def make_params(key, d_model, d_k, d_v, n_heads):
    ks = jax.random.split(key, 4)
    hk, hv = d_k * n_heads, d_v * n_heads
    return {
        "wq": xavier(ks[0], d_model, hk), "bq": jnp.zeros((1, hk), jnp.float32),
        "wk": xavier(ks[1], d_model, hk), "bk": jnp.zeros((1, hk), jnp.float32),
        "wv": xavier(ks[2], d_model, hv), "bv": jnp.zeros((1, hv), jnp.float32),
        "wo": xavier(ks[3], hv, d_model), "bo": jnp.zeros((1, d_model), jnp.float32),
    }


# ----------------------------------------------------------------------------
# Pure-JAX f32 reference (mirrors the PyTorch forward) for a sanity check.
# ----------------------------------------------------------------------------
def ref_mha(q, k, v, mask, p, *, n_heads, d_k, d_v):
    B, Sq, D = q.shape
    Skv = k.shape[1]
    Q = (q @ p["wq"] + p["bq"]).reshape(B, Sq, n_heads, d_k).transpose(0, 2, 1, 3)
    K = (k @ p["wk"] + p["bk"]).reshape(B, Skv, n_heads, d_k).transpose(0, 2, 1, 3)
    V = (v @ p["wv"] + p["bv"]).reshape(B, Skv, n_heads, d_v).transpose(0, 2, 1, 3)
    scores = jnp.einsum("bhqd,bhkd->bhqk", Q, K) / np.sqrt(d_k)
    scores = jnp.where(mask[:, None, :, :] > 0.5, -1e9, scores)
    attn = jax.nn.softmax(scores, axis=-1)
    ctx = jnp.einsum("bhqk,bhkd->bhqd", attn, V)
    ctx = ctx.transpose(0, 2, 1, 3).reshape(B, Sq, n_heads * d_v)
    return ctx @ p["wo"] + p["bo"]


# ----------------------------------------------------------------------------
if __name__ == "__main__":
    # small shapes consistent with the module
    B, S = 2, 8
    d_model, d_k, d_v, n_heads = 32, 8, 8, 4

    key = jax.random.PRNGKey(0)
    k_x, k_p = jax.random.split(key)

    x = jax.random.normal(k_x, (B, S, d_model), jnp.float32)

    # padding-style mask: mask out the last two key positions of batch element 1
    mask_bool = np.zeros((B, S, S), dtype=bool)
    mask_bool[1, :, -2:] = True
    mask = jnp.asarray(mask_bool, dtype=jnp.float32)

    params = make_params(k_p, d_model, d_k, d_v, n_heads)

    # self-attention: q = k = v = x
    out = multi_head_attention(x, x, x, mask, params,
                               n_heads=n_heads, d_k=d_k, d_v=d_v)
    out = jax.block_until_ready(out)

    ref = ref_mha(x, x, x, mask, params, n_heads=n_heads, d_k=d_k, d_v=d_v)

    # bf16 MXU operands + approx reciprocal -> loosen tolerance vs f32 reference
    np.testing.assert_allclose(np.asarray(out), np.asarray(ref),
                               rtol=5e-2, atol=5e-2)

    print("KERNEL_OK")
</pallas_src>

<mosaic_0001>
module attributes {stable_mosaic.version = 11 : i64} {
  func.func @_mha_kernel(%arg0: i32, %arg1: i32, %arg2: memref<1x8x32xf32, #tpu.memory_space<vmem>>, %arg3: memref<1x8x32xf32, #tpu.memory_space<vmem>>, %arg4: memref<1x8x32xf32, #tpu.memory_space<vmem>>, %arg5: memref<1x8x8xf32, #tpu.memory_space<vmem>>, %arg6: memref<32x32xbf16, #tpu.memory_space<vmem>>, %arg7: memref<1x32xf32, #tpu.memory_space<vmem>>, %arg8: memref<32x32xbf16, #tpu.memory_space<vmem>>, %arg9: memref<1x32xf32, #tpu.memory_space<vmem>>, %arg10: memref<32x32xbf16, #tpu.memory_space<vmem>>, %arg11: memref<1x32xf32, #tpu.memory_space<vmem>>, %arg12: memref<32x32xbf16, #tpu.memory_space<vmem>>, %arg13: memref<1x32xf32, #tpu.memory_space<vmem>>, %arg14: memref<1x8x32xf32, #tpu.memory_space<vmem>>) attributes {dimension_semantics = [#tpu.dimension_semantics<parallel>, #tpu.dimension_semantics<parallel>], iteration_bounds = array<i64: 2, 1>, scalar_prefetch = 0 : i64, scratch_operands = 0 : i64, tpu.core_type = #tpu.core_type<tc>, window_params = [{transform_indices = @transform_0, window_bounds = array<i64: 1, 8, 32>}, {transform_indices = @transform_1, window_bounds = array<i64: 1, 8, 32>}, {transform_indices = @transform_2, window_bounds = array<i64: 1, 8, 32>}, {transform_indices = @transform_3, window_bounds = array<i64: 1, 8, 8>}, {pipeline_mode = #tpu.pipeline_mode<synchronous>, transform_indices = @transform_4, window_bounds = array<i64: 32, 32>}, {pipeline_mode = #tpu.pipeline_mode<synchronous>, transform_indices = @transform_5, window_bounds = array<i64: 1, 32>}, {pipeline_mode = #tpu.pipeline_mode<synchronous>, transform_indices = @transform_6, window_bounds = array<i64: 32, 32>}, {pipeline_mode = #tpu.pipeline_mode<synchronous>, transform_indices = @transform_7, window_bounds = array<i64: 1, 32>}, {pipeline_mode = #tpu.pipeline_mode<synchronous>, transform_indices = @transform_8, window_bounds = array<i64: 32, 32>}, {pipeline_mode = #tpu.pipeline_mode<synchronous>, transform_indices = @transform_9, window_bounds = array<i64: 1, 32>}, {pipeline_mode = #tpu.pipeline_mode<synchronous>, transform_indices = @transform_10, window_bounds = array<i64: 32, 32>}, {pipeline_mode = #tpu.pipeline_mode<synchronous>, transform_indices = @transform_11, window_bounds = array<i64: 1, 32>}, {transform_indices = @transform_12, window_bounds = array<i64: 1, 8, 32>}]} {
    %c0 = arith.constant 0 : index
    %c0_0 = arith.constant 0 : index
    %c0_1 = arith.constant 0 : index
    %0 = vector.load %arg2[%c0, %c0_0, %c0_1] : memref<1x8x32xf32, #tpu.memory_space<vmem>>, vector<1x8x32xf32>
    %1 = vector.shape_cast %0 : vector<1x8x32xf32> to vector<8x32xf32>
    %2 = arith.truncf %1 : vector<8x32xf32> to vector<8x32xbf16>
    %c0_2 = arith.constant 0 : index
    %c0_3 = arith.constant 0 : index
    %c0_4 = arith.constant 0 : index
    %3 = vector.load %arg3[%c0_2, %c0_3, %c0_4] : memref<1x8x32xf32, #tpu.memory_space<vmem>>, vector<1x8x32xf32>
    %4 = vector.shape_cast %3 : vector<1x8x32xf32> to vector<8x32xf32>
    %5 = arith.truncf %4 : vector<8x32xf32> to vector<8x32xbf16>
    %c0_5 = arith.constant 0 : index
    %c0_6 = arith.constant 0 : index
    %c0_7 = arith.constant 0 : index
    %6 = vector.load %arg4[%c0_5, %c0_6, %c0_7] : memref<1x8x32xf32, #tpu.memory_space<vmem>>, vector<1x8x32xf32>
    %7 = vector.shape_cast %6 : vector<1x8x32xf32> to vector<8x32xf32>
    %8 = arith.truncf %7 : vector<8x32xf32> to vector<8x32xbf16>
    %c0_8 = arith.constant 0 : index
    %c0_9 = arith.constant 0 : index
    %9 = vector.load %arg6[%c0_8, %c0_9] : memref<32x32xbf16, #tpu.memory_space<vmem>>, vector<32x32xbf16>
    %cst = arith.constant dense<0.000000e+00> : vector<8x32xf32>
    %10 = tpu.matmul %2, %9, %cst {dimension_numbers = #tpu.dot_dimension_numbers<[1], [0], [0], [1], [0, 0, 1, 1], [], []>} : vector<8x32xbf16>, vector<32x32xbf16>, vector<8x32xf32> -> vector<8x32xf32>
    %c0_10 = arith.constant 0 : index
    %c0_11 = arith.constant 0 : index
    %11 = vector.load %arg7[%c0_10, %c0_11] : memref<1x32xf32, #tpu.memory_space<vmem>>, vector<1x32xf32>
    %12 = vector.broadcast %11 : vector<1x32xf32> to vector<8x32xf32>
    %13 = arith.addf %10, %12 : vector<8x32xf32>
    %cst_12 = arith.constant 0.353553385 : f32
    %14 = vector.broadcast %cst_12 : f32 to vector<8x32xf32>
    %15 = arith.mulf %13, %14 : vector<8x32xf32>
    %c0_13 = arith.constant 0 : index
    %c0_14 = arith.constant 0 : index
    %16 = vector.load %arg8[%c0_13, %c0_14] : memref<32x32xbf16, #tpu.memory_space<vmem>>, vector<32x32xbf16>
    %cst_15 = arith.constant dense<0.000000e+00> : vector<8x32xf32>
    %17 = tpu.matmul %5, %16, %cst_15 {dimension_numbers = #tpu.dot_dimension_numbers<[1], [0], [0], [1], [0, 0, 1, 1], [], []>} : vector<8x32xbf16>, vector<32x32xbf16>, vector<8x32xf32> -> vector<8x32xf32>
    %c0_16 = arith.constant 0 : index
    %c0_17 = arith.constant 0 : index
    %18 = vector.load %arg9[%c0_16, %c0_17] : memref<1x32xf32, #tpu.memory_space<vmem>>, vector<1x32xf32>
    %19 = vector.broadcast %18 : vector<1x32xf32> to vector<8x32xf32>
    %20 = arith.addf %17, %19 : vector<8x32xf32>
    %c0_18 = arith.constant 0 : index
    %c0_19 = arith.constant 0 : index
    %21 = vector.load %arg10[%c0_18, %c0_19] : memref<32x32xbf16, #tpu.memory_space<vmem>>, vector<32x32xbf16>
    %cst_20 = arith.constant dense<0.000000e+00> : vector<8x32xf32>
    %22 = tpu.matmul %8, %21, %cst_20 {dimension_numbers = #tpu.dot_dimension_numbers<[1], [0], [0], [1], [0, 0, 1, 1], [], []>} : vector<8x32xbf16>, vector<32x32xbf16>, vector<8x32xf32> -> vector<8x32xf32>
    %c0_21 = arith.constant 0 : index
    %c0_22 = arith.constant 0 : index
    %23 = vector.load %arg11[%c0_21, %c0_22] : memref<1x32xf32, #tpu.memory_space<vmem>>, vector<1x32xf32>
    %24 = vector.broadcast %23 : vector<1x32xf32> to vector<8x32xf32>
    %25 = arith.addf %22, %24 : vector<8x32xf32>
    %26 = vector.shape_cast %15 : vector<8x32xf32> to vector<8x4x8xf32>
    %27 = tpu.transpose %26, [1, 0, 2] : vector<8x4x8xf32> -> vector<4x8x8xf32>
    %28 = vector.shape_cast %20 : vector<8x32xf32> to vector<8x4x8xf32>
    %29 = tpu.transpose %28, [1, 0, 2] : vector<8x4x8xf32> -> vector<4x8x8xf32>
    %30 = vector.shape_cast %25 : vector<8x32xf32> to vector<8x4x8xf32>
    %31 = tpu.transpose %30, [1, 0, 2] : vector<8x4x8xf32> -> vector<4x8x8xf32>
    %32 = arith.truncf %27 : vector<4x8x8xf32> to vector<4x8x8xbf16>
    %33 = arith.truncf %29 : vector<4x8x8xf32> to vector<4x8x8xbf16>
    "tpu.trace_start"() <{level = 10 : i32, message = "hqd,hkd->hqk"}> : () -> ()
    %cst_23 = arith.constant dense<0.000000e+00> : vector<4x8x8xf32>
    %34 = tpu.matmul %32, %33, %cst_23 {dimension_numbers = #tpu.dot_dimension_numbers<[2], [2], [1], [1], [0, 0, 0, 1, 1, 1], [0], [0]>} : vector<4x8x8xbf16>, vector<4x8x8xbf16>, vector<4x8x8xf32> -> vector<4x8x8xf32>
    "tpu.trace_stop"() : () -> ()
    %c0_24 = arith.constant 0 : index
    %c0_25 = arith.constant 0 : index
    %c0_26 = arith.constant 0 : index
    %35 = vector.load %arg5[%c0_24, %c0_25, %c0_26] : memref<1x8x8xf32, #tpu.memory_space<vmem>>, vector<1x8x8xf32>
    %36 = vector.shape_cast %35 : vector<1x8x8xf32> to vector<8x8xf32>
    %cst_27 = arith.constant 5.000000e-01 : f32
    %37 = vector.broadcast %cst_27 : f32 to vector<8x8xf32>
    %38 = arith.cmpf ogt, %36, %37 : vector<8x8xf32>
    %cst_28 = arith.constant -1.000000e+09 : f32
    %cst_29 = arith.constant 0.000000e+00 : f32
    %39 = vector.broadcast %cst_28 : f32 to vector<8x8xf32>
    %40 = vector.broadcast %cst_29 : f32 to vector<8x8xf32>
    %41 = arith.select %38, %39, %40 : vector<8x8xi1>, vector<8x8xf32>
    %42 = vector.shape_cast %41 : vector<8x8xf32> to vector<1x8x8xf32>
    %43 = vector.broadcast %42 : vector<1x8x8xf32> to vector<4x8x8xf32>
    %44 = arith.addf %34, %43 : vector<4x8x8xf32>
    %cst_30 = arith.constant dense<0xFF800000> : vector<4x8xf32>
    %45 = vector.multi_reduction <maximumf>, %44, %cst_30 [2] : vector<4x8x8xf32> to vector<4x8xf32>
    %46 = vector.shape_cast %45 : vector<4x8xf32> to vector<4x8x1xf32>
    %47 = vector.broadcast %46 : vector<4x8x1xf32> to vector<4x8x8xf32>
    %48 = arith.subf %44, %47 : vector<4x8x8xf32>
    %49 = math.exp %48 : vector<4x8x8xf32>
    %cst_31 = arith.constant dense<0.000000e+00> : vector<4x8xf32>
    %50 = vector.multi_reduction <add>, %49, %cst_31 [2] : vector<4x8x8xf32> to vector<4x8xf32>
    %51 = vector.shape_cast %50 : vector<4x8xf32> to vector<4x8x1xf32>
    %52 = tpu.reciprocal %51 {approx = true} : vector<4x8x1xf32> -> vector<4x8x1xf32>
    %53 = vector.broadcast %52 : vector<4x8x1xf32> to vector<4x8x8xf32>
    %54 = arith.mulf %49, %53 : vector<4x8x8xf32>
    %55 = arith.truncf %54 : vector<4x8x8xf32> to vector<4x8x8xbf16>
    %56 = arith.truncf %31 : vector<4x8x8xf32> to vector<4x8x8xbf16>
    "tpu.trace_start"() <{level = 10 : i32, message = "hqk,hkd->hqd"}> : () -> ()
    %cst_32 = arith.constant dense<0.000000e+00> : vector<4x8x8xf32>
    %57 = tpu.matmul %55, %56, %cst_32 {dimension_numbers = #tpu.dot_dimension_numbers<[2], [1], [1], [2], [0, 0, 0, 1, 1, 2], [0], [0]>} : vector<4x8x8xbf16>, vector<4x8x8xbf16>, vector<4x8x8xf32> -> vector<4x8x8xf32>
    "tpu.trace_stop"() : () -> ()
    %58 = tpu.transpose %57, [1, 0, 2] : vector<4x8x8xf32> -> vector<8x4x8xf32>
    %59 = vector.shape_cast %58 : vector<8x4x8xf32> to vector<8x32xf32>
    %60 = arith.truncf %59 : vector<8x32xf32> to vector<8x32xbf16>
    %c0_33 = arith.constant 0 : index
    %c0_34 = arith.constant 0 : index
    %61 = vector.load %arg12[%c0_33, %c0_34] : memref<32x32xbf16, #tpu.memory_space<vmem>>, vector<32x32xbf16>
    %cst_35 = arith.constant dense<0.000000e+00> : vector<8x32xf32>
    %62 = tpu.matmul %60, %61, %cst_35 {dimension_numbers = #tpu.dot_dimension_numbers<[1], [0], [0], [1], [0, 0, 1, 1], [], []>} : vector<8x32xbf16>, vector<32x32xbf16>, vector<8x32xf32> -> vector<8x32xf32>
    %c0_36 = arith.constant 0 : index
    %c0_37 = arith.constant 0 : index
    %63 = vector.load %arg13[%c0_36, %c0_37] : memref<1x32xf32, #tpu.memory_space<vmem>>, vector<1x32xf32>
    %64 = vector.broadcast %63 : vector<1x32xf32> to vector<8x32xf32>
    %65 = arith.addf %62, %64 : vector<8x32xf32>
    %c0_38 = arith.constant 0 : index
    %c0_39 = arith.constant 0 : index
    %c0_40 = arith.constant 0 : index
    %66 = vector.load %arg14[%c0_38, %c0_39, %c0_40] : memref<1x8x32xf32, #tpu.memory_space<vmem>>, vector<1x8x32xf32>
    %67 = vector.shape_cast %66 : vector<1x8x32xf32> to vector<8x32xf32>
    %68 = vector.shape_cast %65 : vector<8x32xf32> to vector<1x8x32xf32>
    tpu.vector_store %arg14[%c0_38, %c0_39, %c0_40], %68 {strides = array<i32>} : memref<1x8x32xf32, #tpu.memory_space<vmem>>, vector<1x8x32xf32>,
    return
  }
  func.func @transform_0(%arg0: i32, %arg1: i32) -> (i32, i32, i32) {
    %c0_i32 = arith.constant 0 : i32
    %c0_i32_0 = arith.constant 0 : i32
    return %arg0, %arg1, %c0_i32 : i32, i32, i32
  }
  func.func @transform_1(%arg0: i32, %arg1: i32) -> (i32, i32, i32) {
    %c0_i32 = arith.constant 0 : i32
    %c0_i32_0 = arith.constant 0 : i32
    %c0_i32_1 = arith.constant 0 : i32
    return %arg0, %c0_i32, %c0_i32_0 : i32, i32, i32
  }
  func.func @transform_2(%arg0: i32, %arg1: i32) -> (i32, i32, i32) {
    %c0_i32 = arith.constant 0 : i32
    %c0_i32_0 = arith.constant 0 : i32
    %c0_i32_1 = arith.constant 0 : i32
    return %arg0, %c0_i32, %c0_i32_0 : i32, i32, i32
  }
  func.func @transform_3(%arg0: i32, %arg1: i32) -> (i32, i32, i32) {
    %c0_i32 = arith.constant 0 : i32
    %c0_i32_0 = arith.constant 0 : i32
    return %arg0, %arg1, %c0_i32 : i32, i32, i32
  }
  func.func @transform_4(%arg0: i32, %arg1: i32) -> (i32, i32) {
    %c0_i32 = arith.constant 0 : i32
    %c0_i32_0 = arith.constant 0 : i32
    %c0_i32_1 = arith.constant 0 : i32
    return %c0_i32, %c0_i32_0 : i32, i32
  }
  func.func @transform_5(%arg0: i32, %arg1: i32) -> (i32, i32) {
    %c0_i32 = arith.constant 0 : i32
    %c0_i32_0 = arith.constant 0 : i32
    %c0_i32_1 = arith.constant 0 : i32
    return %c0_i32, %c0_i32_0 : i32, i32
  }
  func.func @transform_6(%arg0: i32, %arg1: i32) -> (i32, i32) {
    %c0_i32 = arith.constant 0 : i32
    %c0_i32_0 = arith.constant 0 : i32
    %c0_i32_1 = arith.constant 0 : i32
    return %c0_i32, %c0_i32_0 : i32, i32
  }
  func.func @transform_7(%arg0: i32, %arg1: i32) -> (i32, i32) {
    %c0_i32 = arith.constant 0 : i32
    %c0_i32_0 = arith.constant 0 : i32
    %c0_i32_1 = arith.constant 0 : i32
    return %c0_i32, %c0_i32_0 : i32, i32
  }
  func.func @transform_8(%arg0: i32, %arg1: i32) -> (i32, i32) {
    %c0_i32 = arith.constant 0 : i32
    %c0_i32_0 = arith.constant 0 : i32
    %c0_i32_1 = arith.constant 0 : i32
    return %c0_i32, %c0_i32_0 : i32, i32
  }
  func.func @transform_9(%arg0: i32, %arg1: i32) -> (i32, i32) {
    %c0_i32 = arith.constant 0 : i32
    %c0_i32_0 = arith.constant 0 : i32
    %c0_i32_1 = arith.constant 0 : i32
    return %c0_i32, %c0_i32_0 : i32, i32
  }
  func.func @transform_10(%arg0: i32, %arg1: i32) -> (i32, i32) {
    %c0_i32 = arith.constant 0 : i32
    %c0_i32_0 = arith.constant 0 : i32
    %c0_i32_1 = arith.constant 0 : i32
    return %c0_i32, %c0_i32_0 : i32, i32
  }
  func.func @transform_11(%arg0: i32, %arg1: i32) -> (i32, i32) {
    %c0_i32 = arith.constant 0 : i32
    %c0_i32_0 = arith.constant 0 : i32
    %c0_i32_1 = arith.constant 0 : i32
    return %c0_i32, %c0_i32_0 : i32, i32
  }
  func.func @transform_12(%arg0: i32, %arg1: i32) -> (i32, i32, i32) {
    %c0_i32 = arith.constant 0 : i32
    %c0_i32_0 = arith.constant 0 : i32
    return %arg0, %arg1, %c0_i32 : i32, i32, i32
  }
}

</mosaic_0001>

<bundles_post_ra>
// kernel: tpu_custom_call.1
= control target key start
LH: loop header
LB: loop body
LE: loop exit
PB: predicated region body
PF: predicated region fallthrough
CT: control target
= control target key end

     0   :  { %s2825_s0 = inlined_call_operand.hbm [shape: f32[2,8,32], index: 0, kind: input, shape index: {}]   ;;  %s2826_s1 = inlined_call_operand.hbm [shape: f32[2,8,32], index: 1, kind: input, shape index: {}]   ;;  %s2827_s2 = inlined_call_operand.hbm [shape: f32[2,8,32], index: 2, kind: input, shape index: {}]   ;;  %s2828_s3 = inlined_call_operand.hbm [shape: f32[2,8,8], index: 3, kind: input, shape index: {}]   ;;  %s2829_s4 = inlined_call_operand.hbm [shape: bf16[32,32], index: 4, kind: input, shape index: {}]   ;;  %s2830_s5 = inlined_call_operand.vmem [shape: f32[1,32], index: 5, kind: input, shape index: {}]   ;;  %s2831_s6 = inlined_call_operand.hbm [shape: bf16[32,32], index: 6, kind: input, shape index: {}]   ;;  %s2832_s7 = inlined_call_operand.vmem [shape: f32[1,32], index: 7, kind: input, shape index: {}]   ;;  %s2833_s8 = inlined_call_operand.hbm [shape: bf16[32,32], index: 8, kind: input, shape index: {}]   ;;  %s2834_s9 = inlined_call_operand.vmem [shape: f32[1,32], index: 9, kind: input, shape index: {}]   ;;  %s2835_s10 = inlined_call_operand.hbm [shape: bf16[32,32], index: 10, kind: input, shape index: {}]   ;;  %s2836_s11 = inlined_call_operand.vmem [shape: f32[1,32], index: 11, kind: input, shape index: {}]   ;;  %s2837_s12 = inlined_call_operand.hbm [shape: f32[2,8,32], index: 12, kind: output, shape index: {}]  }
   0x1   :  { %2851 = sst [smem:[#allocation31_spill]] %s2825_s0 }
   0x2   :  { %2852 = sst [smem:[#allocation32_spill]] %s2826_s1 }
   0x3   :  { %2853 = sst [smem:[#allocation33_spill]] %s2829_s4 }
   0x4   :  { %2854 = sst [smem:[#allocation34_spill]] %s2831_s6 }
   0x5   :  { %2855 = sst [smem:[#allocation35_spill]] %s2833_s8 }
   0x6   :  { %2856 = sst [smem:[#allocation36_spill]] %s2836_s11 }
   0x7   :  { %2857 = sst [smem:[#allocation37_spill]] %s2837_s12 }
   0x8   :  { %17 = vsyncpa [#allocation3], 0 }
   0x9   :  { %19 = vsyncpa [#allocation3 + $0x1], 0 }
   0xa   :  { %20 = vsyncpa [#allocation6], 0 }
   0xb   :  { %22 = vsyncpa [#allocation6 + $0x1], 0 }
   0xc   :  { %23 = vsyncpa [#allocation9], 0 }
   0xd   :  { %25 = vsyncpa [#allocation9 + $0x1], 0 }
   0xe   :  { %26 = vsyncpa [#allocation12], 0 }
   0xf   :  { %27 = vsyncpa [#allocation15], 0 }
  0x10   :  { %28 = vsyncpa [#allocation4], 0 }
  0x11   :  { %30 = vsyncpa [#allocation4 + $0x1], 0  ;;  %s2348_s21 = smov 0   ;;  %s2350_s22 = smov 0  }
  0x12   :  { %s2352_s23 = smov 0   ;;  %s2354_s24 = smov 0  }
  0x13   :  { %s2356_s25 = smov 0   ;;  %s2358_s26 = smov 0  }
  0x14 LB: > { %2858 = sst [smem:[#allocation24_spill]] %s2246_s21  ;;  %s2379_s27 = sadd.s32 4294967295, %s2266_s26   ;;  %s2266_s26 = sphi %s2358_s26, %s36_s26   ;;  %s2262_s25 = sphi %s2356_s25, %s2888_s25   ;;  %s2258_s24 = sphi %s2354_s24, %s2887_s24   ;;  %s2254_s23 = sphi %s2352_s23, %s2891_s23   ;;  %s2250_s22 = sphi %s2350_s22, %s2890_s22   ;;  %s2246_s21 = sphi %s2348_s21, %s2889_s21  }
  0x15   : > { %2859 = sst [smem:[#allocation25_spill]] %s2258_s24  ;;  %s1694_s28 = sadd.s32 4294967294, %s2266_s26  }
  0x16   : > { %2860 = sst [smem:[#allocation26_spill]] %s2262_s25  ;;  %p70_p0 = scmp.ne.s32.totalorder %s2250_s22, %s2246_s21 }
  0x17   : > { %p71_p1 = scmp.eq.s32.totalorder %s2379_s27, 0  ;;  %p344_p2 = scmp.eq.s32.totalorder %s2379_s27, 1 }
  0x18   : > { %p350_p3 = scmp.eq.s32.totalorder %s1694_s28, 1  ;;  %p1695_p5 = scmp.ge.s32.totalorder %s2266_s26, 1 }
  0x19   : > { %p2388_p4 = por %p71_p1, %p70_p0  ;;  %p357_p7 = scmp.lt.s32.totalorder %s2266_s26, 3 }
  0x1a   : > { %p2393_p6 = por %p350_p3, %p70_p0  ;;  %s2864_s4 = sld [smem:[#allocation33_spill]] }
  0x1b   : > { %p2401_p8 = pnand %p1695_p5, %p357_p7  ;;  %s2268_s17 = smov [#allocation10]  }
  0x1c   : > { %s2862_s30 = scalar_select %p2393_p6, 1, 0 }
  0x1d   : > { %p1801_p9 = pneg %p2401_p8  ;;  %s370_s18 = sshll.u32 %s2268_s17, 4  ;;  %s371_s18 = int_to_ptr.vmem [resolvable:$true] %s370_s18 }
  0x1e   : > { %2863 = sst [smem:[#allocation27_spill]] %s2862_s30  ;;  %p1700_p11 = scmp.ge.s32.totalorder %s2266_s26, 2 }
  0x1f   : > { %p2409_p10 = pnand %p1801_p9, %p71_p1  ;;  %s2867_s6 = sld [smem:[#allocation34_spill]] }
  0x20   : > { %s368_s15 = sshll.u32 %s2864_s4, 4  ;;  %s2839_s14 = smov 64   ;;  %s369_s15 = int_to_ptr.hbm [resolvable:$true] %s368_s15 }
  0x21   : > { %s2841_s17 = smov 4   ;;  %s2271_s4 = smov [#allocation11]  }
  0x22   : > { %1804 = dma.hbm_to_vmem [thread:$0]  (!%p2409_p10), %s369_s15, 256, %s371_s18, [#allocation9], %s2839_s14, %s2839_s14, %s2841_s17  }
  0x23   : > { %s387_s30 = sshll.u32 %s2271_s4, 4  ;;  %s48_s20 = sadd.s32 1, %s2262_s25  ;;  %s388_s30 = int_to_ptr.vmem [resolvable:$true] %s387_s30 }
  0x24   : > { %s57_s28 = sadd.s32 1, %s2254_s23  ;;  %p50_p12 = scmp.ge.s32.totalorder %s48_s20, 2 }
  0x25   : > { %s385_s13 = sshll.u32 %s2867_s6, 4  ;;  %p64_p13 = scmp.ne.s32.totalorder %s2254_s23, %s2250_s22  ;;  %s386_s13 = int_to_ptr.hbm [resolvable:$true] %s385_s13 }
  0x26   : > { %1807 = dma.hbm_to_vmem [thread:$0]  (!%p2409_p10), %s386_s13, 256, %s388_s30, [#allocation12], %s2839_s14, %s2839_s14, %s2841_s17  }
  0x27   : > { %p65_p0 = scmp.eq.s32.totalorder %s2266_s26, 0  ;;  %p1835_p3 = scmp.lt.s32.totalorder %s2266_s26, 2 }
  0x28   : > { %s2893_s20 = smov (%p50_p12, %s48_s20), 0  ;;  %p2437_p7 = por %p344_p2, %p64_p13 }
  0x29   : > { %2868 = sst [smem:[#allocation28_spill]] %s2893_s20  ;;  %p66_p5 = por %p65_p0, %p64_p13 }
  0x2a   : > { %s2869_s4 = scalar_select %p2437_p7, 1, 0 }
  0x2b   : > { %s52_s15 = ssub.s32 %s2262_s25, %s2893_s20  ;;  %s2845_s30 = sand.u32 1, %s2254_s23  }
  0x2c   : > { %2870 = sst [smem:[#allocation29_spill]] %s2869_s4  ;;  %p55_p9 = scmp.eq.s32.totalorder %s52_s15, 0 }
  0x2d   : > { %s2446_s18 = sshll.u32 %s2845_s30, 3  ;;  %s2449_s13 = sshll.u32 %s2262_s25, 3 }
  0x2e   : > { %p2451_p12 = pnand %p1835_p3, %p66_p5  ;;  %s2850_s6 = sand.u32 1, %s2266_s26  }
  0x2f   : > { %s2456_s17 = scalar_select %p55_p9, %s2254_s23, %s57_s28  }
  0x30   : > { %s2873_s1 = sld [smem:[#allocation32_spill]]  ;;  %s462_s11 = scalar_lea.vmem [#allocation5], %s2446_s18 }
  0x31   : > { %2872 = sst [smem:[#allocation30_spill]] %s2456_s17  ;;  %s470_s30 = sshll.u32 %s462_s11, 4  ;;  %s471_s30 = int_to_ptr.vmem [resolvable:$true] %s470_s30 }
  0x32   : > { %s2466_s25 = scalar_lea.sflag [#allocation6], %s2850_s6  ;;  %s2874_s8 = sld [smem:[#allocation35_spill]] }
  0x33   : > { %s2272_s21 = smov [#allocation13]   ;;  %s2875_s6 = smov 4  }
  0x34   : > { %s404_s11 = sshll.u32 %s2272_s21, 4  ;;  %s2876_s24 = smov 64   ;;  %s405_s11 = int_to_ptr.vmem [resolvable:$true] %s404_s11 }
  0x35   : > { %s2273_s17 = smov [#allocation14]   ;;  %s2877_s0 = sld [smem:[#allocation31_spill]] }
  0x36   : > { %s466_s15 = scalar_lea.hbm %s2873_s1, %s2449_s13  ;;  %s419_s1 = sshll.u32 %s2835_s10, 4  ;;  %s420_s1 = int_to_ptr.hbm [resolvable:$true] %s419_s1 }
  0x37   : > { %s468_s4 = sshll.u32 %s466_s15, 4  ;;  %s442_s20 = scalar_lea.vmem [#allocation2], %s2446_s18  ;;  %s469_s4 = int_to_ptr.hbm [resolvable:$true] %s468_s4 }
  0x38   : > { %1820 = dma.hbm_to_vmem [thread:$0]  (!%p2451_p12), %s469_s4, 128, %s471_s30, %s2466_s25  }
  0x39   : > { %s402_s12 = sshll.u32 %s2874_s8, 4  ;;  %s421_s4 = sshll.u32 %s2273_s17, 4  ;;  %s403_s12 = int_to_ptr.hbm [resolvable:$true] %s402_s12  ;;  %s422_s4 = int_to_ptr.vmem [resolvable:$true] %s421_s4 }
  0x3a   : > { %1810 = dma.hbm_to_vmem [thread:$0]  (!%p2409_p10), %s403_s12, 256, %s405_s11, [#allocation12], %s2876_s24, %s2876_s24, %s2875_s6  }
  0x3b   : > { %1813 = dma.hbm_to_vmem [thread:$0]  (!%p2409_p10), %s420_s1, 256, %s422_s4, [#allocation15], %s2876_s24, %s2876_s24, %s2875_s6  }
  0x3c   : > { %s447_s21 = scalar_lea.hbm %s2877_s0, %s2449_s13  ;;  %s451_s15 = sshll.u32 %s442_s20, 4  ;;  %s452_s15 = int_to_ptr.vmem [resolvable:$true] %s451_s15 }
  0x3d   : > { %s449_s12 = sshll.u32 %s447_s21, 4  ;;  %s2878_s11 = sand.u32 1, %s2254_s23   ;;  %s450_s12 = int_to_ptr.hbm [resolvable:$true] %s449_s12 }
  0x3e   : > { %s439_s19 = scalar_lea.sflag [#allocation3], %s2878_s11  ;;  %s485_s1 = scalar_lea.hbm %s2827_s2, %s2449_s13 }
  0x3f   : > { %1817 = dma.hbm_to_vmem [thread:$0]  (!%p2451_p12), %s450_s12, 128, %s452_s15, %s439_s19  }
  0x40   : > { %s481_s6 = scalar_lea.vmem [#allocation7], %s2446_s18  ;;  %s487_s4 = sshll.u32 %s485_s1, 4  ;;  %s488_s4 = int_to_ptr.hbm [resolvable:$true] %s487_s4 }
  0x41   : > { %s489_s24 = sshll.u32 %s481_s6, 4  ;;  %s505_s21 = scalar_lea.hbm %s2828_s3, %s2449_s13  ;;  %s490_s24 = int_to_ptr.vmem [resolvable:$true] %s489_s24 }
  0x42   : > { %1823 = dma.hbm_to_vmem [thread:$0]  (!%p2451_p12), %s488_s4, 128, %s490_s24, %s2466_s25  }
  0x43   : > { %s500_s20 = scalar_lea.vmem [#allocation8], %s2446_s18  ;;  %s507_s0 = sshll.u32 %s505_s21, 4  ;;  %s508_s0 = int_to_ptr.hbm [resolvable:$true] %s507_s0 }
  0x44   : > { %s509_s11 = sshll.u32 %s500_s20, 4  ;;  %s2879_s15 = sand.u32 1, %s2266_s26   ;;  %s510_s11 = int_to_ptr.vmem [resolvable:$true] %s509_s11 }
  0x45   : > { %s497_s12 = scalar_lea.sflag [#allocation9], %s2879_s15  ;;  %518 = sbr.rel (%p2401_p8) target bundleno = 1189 (0x4a5), region = 68 }
  0x46   : > { %1826 = dma.hbm_to_vmem [thread:$0]  (!%p2451_p12), %s508_s0, 128, %s510_s11, %s497_s12  }
  0x47   : > { %s2516_s8 = sand.u32 (!%p2401_p8), 1, %s2250_s22  }
  0x48   : > { %s2519_s25 = sshll.u32 (!%p2401_p8), %s2516_s8, 3  ;;  %s521_s18 = scalar_lea.sflag (!%p2401_p8), [#allocation3], %s2516_s8 }
  0x49   : > { %s524_s13 = scalar_lea.vmem (!%p2401_p8), [#allocation2], %s2519_s25 }
  0x4a   : > { %2217 = dma.done.wait (%p2388_p4), %s521_s18, 128  }
  0x4b   : > { %2219 = vsyncadd (%p2388_p4), %s521_s18, 4294967168  ;;  %s530_s0 = sand.u32 1, %s2379_s27   ;;  %s534_s14 = scalar_lea.vmem [#allocation5], %s2519_s25 }
  0x4c   : > { %s531_s16 = scalar_lea.sflag [#allocation6], %s530_s0 }
  0x4d   : > { %2221 = dma.done.wait (%p2388_p4), %s531_s16, 256  }
  0x4e   : > { %2223 = vsyncadd (%p2388_p4), %s531_s16, 4294967040  ;;  %s544_s19 = scalar_lea.vmem [#allocation7], %s2519_s25  ;;  %s551_s17 = scalar_lea.sflag [#allocation9], %s530_s0 }
  0x4f   : > { %s554_s1 = scalar_lea.vmem [#allocation8], %s2519_s25 }
  0x50   : > { %2225 = dma.done.wait (%p2388_p4), %s551_s17, 128  }
  0x51   : > { %2227 = vsyncadd (%p2388_p4), %s551_s17, 4294967168 }
  0x52   : > { %2229 = dma.done.wait (%p71_p1), [#allocation9], 256  }
  0x53   : > { %2231 = vsyncadd (%p71_p1), [#allocation9], 4294967040 }
  0x54   : > { %2233 = dma.done.wait (%p71_p1), [#allocation12], 512  }
  0x55   : > { %2235 = vsyncadd (%p71_p1), [#allocation12], 4294966784 }
  0x56   : > { %2237 = dma.done.wait (%p71_p1), [#allocation15], 256  }
  0x57   : > { %2239 = vsyncadd (%p71_p1), [#allocation15], 4294967040  ;;  %v1768_v0 = vld [vmem:[#allocation10 + $0x8] sm:$0xff]  ;;  %v1770_v1 = vld [vmem:[#allocation11 + $0x8] sm:$0xff]  ;;  %vm658_vm0 = vcmask 261120   ;;  %s2274_s4 = smov 104  }
  0x58   : > { %v1767_v2 = vld [vmem:[#allocation10] sm:$0xff]  ;;  %v1769_v3 = vld [vmem:[#allocation11] sm:$0xff]  ;;  %668 = vmatpush.bf16.msra.mxu0 %v1768_v0  ;;  %705 = vmatpush.bf16.msra.mxu1 %v1770_v1  ;;  %s2275_s30 = smov 120   ;;  %s2276_s28 = smov 112   ;;  %v1772_v17 = vld [vmem:[#allocation13 + $0x8] sm:$0xff]  ;;  %vm759_vm1 = vcmask 1047556  }
  0x59   : > { %v632_v4 = vld [vmem:[%s524_s13] sm:$0xff]  ;;  %v634_v5 = vld [vmem:[%s534_s14] sm:$0xff]  ;;  %741 = vmatpush.bf16.msra.mxu2 %v1772_v17  ;;  %v2277_v22 = vmov 1983009808   ;;  %v2278_v35 = vmov 1934713408  }
  0x5a   : > { %v633_v6 = vpack.c.bf16 %v632_v4, %v632_v4  ;;  %v635_v7 = vpack.c.bf16 %v634_v5, %v634_v5  ;;  %v1904_v8 = vld [vmem:[%s2830_s5] ss:$0 sm:$0xff]  ;;  %v764_v23 = vunpack.c.l.s4 %v2277_v22  ;;  %v788_v36 = vunpack.c.l.s4 %v2278_v35  ;;  %s2280_s11 = smov 24   ;;  %s2281_s15 = smov 16  }
  0x5b   : > { %v1905_v9 = vld [vmem:[%s2832_s7] ss:$0 sm:$0xff]  ;;  %vm1120_vm2 = vcmask 64512   ;;  %vm1252_vm4 = vcmask 1043456   ;;  %s2282_s12 = smov 8   ;;  %s2880_s18 = sld [smem:[#allocation25_spill]] }
  0x5c   : > { %669 = vmatpush.bf16.msra.mxu0 %v1767_v2  ;;  %706 = vmatpush.bf16.msra.mxu1 %v1769_v3  ;;  %v1771_v18 = vld [vmem:[#allocation13] sm:$0xff]  ;;  %v2569_v31 = vunpack.c.0.s8 %v764_v23  ;;  %v2578_v44 = vunpack.c.0.s8 %v788_v36  ;;  %vm1449_vm5 = vcmask 130048   ;;  %vm1451_vm6 = vcmask 195584   ;;  %s2881_s14 = sld [smem:[#allocation37_spill]]  ;;  %s630_s6 = scalar_lea.vmem [#allocation16], %s2519_s25 }
  0x5d   : > { %742 = vmatpush.bf16.msra.mxu2 %v1771_v18  ;;  %v636_v19 = vld [vmem:[%s544_s19] sm:$0xff]  ;;  %s2883_s27 = sld [smem:[#allocation36_spill]]  ;;  %s1505_s24 = sshll.u32 %s630_s6, 4  ;;  %s1506_s24 = int_to_ptr.vmem [resolvable:$true] %s1505_s24 }
  0x5e   : > { %v637_v20 = vpack.c.bf16 %v636_v19, %v636_v19 }
  0x5f   : > { %1727 = vmatmul.msk.bf16.vlgmr.msra.gmra.mxu0 %vm658_vm0, %v633_v6  ;;  %1736 = vmatmul.msk.bf16.vlgmr.msra.gmra.mxu1 %vm658_vm0, %v635_v7 }
  0x60   : > { %1745 = vmatmul.msk.bf16.vlgmr.msra.gmra.mxu2 %vm658_vm0, %v637_v20 }
  0x61   : > { %s1764_s13 = sshll.u32 %s2880_s18, 3 }
  0x62   : > { %s1503_s17 = scalar_lea.hbm %s2881_s14, %s1764_s13  ;;  %s2184_s25 = scalar_lea.hbm %s2881_s14, 16 }
  0xdc   : > { %v671_v10 = vpop.f32.mrf.mxu0  ;;  %v708_v11 = vpop.f32.mrf.mxu1 }
  0xdd   : > { %v672_v12 = vadd.f32 %v1904_v8, %v671_v10  ;;  %v709_v13 = vadd.f32 %v1905_v9, %v708_v11 }
  0xdf   : > { %v675_v14 = vmul.f32 0.35355338, %v672_v12  ;;  %876 = vrot.lane.b32.xlu1 %v709_v13, %s2274_s4  ;;  %870 = vrot.lane.b32.xlu0 %v709_v13, %s2275_s30  ;;  %v881_v42 = vrot.slane %v709_v13, 4 }
  0xe1   : > { %752 = vrot.lane.b32.xlu2 %v675_v14, %s2276_s28  ;;  %v761_v29 = vrot.slane %v675_v14, 4 }
  0xe4   : > { %v710_v15 = vpop.f32.mrf.mxu1  ;;  %v673_v16 = vpop.f32.mrf.mxu0 }
  0xe7   : > { %873 = vrot.lane.b32.xlu0 %v709_v13, %s2276_s28  ;;  %749 = vrot.lane.b32.xlu1 %v675_v14, %s2275_s30 }
  0xe9   : > { %755 = vrot.lane.b32.xlu2 %v675_v14, %s2274_s4 }
 0x13b   : > { %v753_v21 = vpop.permute.xlu2 %752 }
 0x13c   : > { %v758_v24 = vrot.slane %v753_v21, 4  ;;  %v762_v37 = vsel %vm759_vm1, %v753_v21, %v761_v29 }
 0x13d   : > { %v770_v43 = vperm.slane %v762_v37, %v2569_v31 }
 0x13e   : > { %v760_v32 = vsel %vm759_vm1, %v758_v24, %v675_v14 }
 0x13f   : > { %v766_v39 = vperm.slane %v760_v32, %v2569_v31  ;;  %v797_v62 = vrot.slane %v770_v43, 4 }
 0x141   : > { %v785_v54 = vrot.slane %v766_v39, 4 }
 0x143   : > { %v756_v34 = vpop.permute.xlu2 %755 }
 0x144   : > { %v771_v41 = vrot.slane %v756_v34, 4 }
 0x151   : > { %v877_v25 = vpop.permute.xlu1 %876  ;;  %v871_v26 = vpop.permute.xlu0 %870 }
 0x152   : > { %v891_v27 = vrot.slane %v877_v25, 4  ;;  %v893_v28 = vrot.slane %v871_v26, 4 }
 0x154   : > { %v894_v30 = vsel %vm759_vm1, %v877_v25, %v893_v28  ;;  %v892_v33 = vsel %vm759_vm1, %v891_v27, %v871_v26 }
 0x155   : > { %v902_v38 = vperm.slane %v894_v30, %v2569_v31  ;;  %v898_v40 = vperm.slane %v892_v33, %v2569_v31 }
 0x157   : > { %v915_v51 = vrot.slane %v902_v38, 4  ;;  %v903_v55 = vrot.slane %v898_v40, 4 }
 0x159   : > { %v874_v45 = vpop.permute.xlu0 %873  ;;  %v750_v46 = vpop.permute.xlu1 %749 }
 0x15a   : > { %v879_v47 = vrot.slane %v874_v45, 4  ;;  %v882_v48 = vsel %vm759_vm1, %v874_v45, %v881_v42  ;;  %v772_v49 = vsel %vm759_vm1, %v771_v41, %v750_v46  ;;  %v773_v50 = vrot.slane %v750_v46, 4 }
 0x15b   : > { %v890_v52 = vperm.slane %v882_v48, %v2569_v31  ;;  %v778_v53 = vperm.slane %v772_v49, %v2569_v31 }
 0x15c   : > { %v880_v56 = vsel %vm759_vm1, %v879_v47, %v709_v13  ;;  %v774_v57 = vsel %vm759_vm1, %v756_v34, %v773_v50 }
 0x15d   : > { %v886_v58 = vperm.slane %v880_v56, %v2569_v31  ;;  %v916_v59 = vsel %vm759_vm1, %v915_v51, %v890_v52  ;;  %v917_v60 = vrot.slane %v890_v52, 4  ;;  %v782_v61 = vperm.slane %v774_v57, %v2569_v31 }
 0x15e   : > { %v922_v63 = vperm.slane %v916_v59, %v2578_v44  ;;  %v783_v0 = vrot.slane %v778_v53, 4  ;;  %v786_v1 = vsel %vm759_vm1, %v778_v53, %v785_v54 }
 0x15f   : > { %v904_v2 = vsel %vm759_vm1, %v903_v55, %v886_v58  ;;  %v905_v3 = vrot.slane %v886_v58, 4  ;;  %v918_v4 = vsel %vm759_vm1, %v902_v38, %v917_v60  ;;  %v794_v5 = vperm.slane %v786_v1, %v2578_v44 }
 0x160   : > { %v910_v6 = vperm.slane %v904_v2, %v2578_v44  ;;  %v926_v7 = vperm.slane %v918_v4, %v2578_v44  ;;  %v931_v8 = vrot.slane %v922_v63, 4  ;;  %v784_v9 = vsel %vm759_vm1, %v783_v0, %v766_v39 }
 0x161   : > { %v906_v10 = vsel %vm759_vm1, %v898_v40, %v905_v3  ;;  %v790_v11 = vperm.slane %v784_v9, %v2578_v44  ;;  %v795_v12 = vrot.slane %v782_v61, 4  ;;  %v798_v13 = vsel %vm759_vm1, %v782_v61, %v797_v62 }
 0x162   : > { %v914_v14 = vperm.slane %v906_v10, %v2578_v44  ;;  %v927_v15 = vrot.slane %v910_v6, 4  ;;  %v932_v16 = vsel %vm759_vm1, 0.0, %v931_v8  ;;  %v933_v17 = vrot.slane %v926_v7, 4 }
 0x163   : > { %v796_v18 = vsel %vm759_vm1, %v795_v12, %v770_v43  ;;  %v806_v19 = vperm.slane %v798_v13, %v2578_v44  ;;  %v807_v20 = vrot.slane %v790_v11, 4  ;;  %v809_v21 = vrot.slane %v794_v5, 4 }
 0x164   : > { %v929_v22 = vrot.slane %v914_v14, 4  ;;  %v934_v23 = vsel %vm759_vm1, 0.0, %v933_v17  ;;  %v946_v24 = vsel %vm759_vm1, %v933_v17, %v922_v63  ;;  %v802_v25 = vperm.slane %v796_v18, %v2578_v44 }
 0x165   : > { %v950_v26 = vperm.slane %v946_v24, %v2569_v31  ;;  %v951_v27 = vrot.slane %v934_v23, 4  ;;  %v808_v28 = vsel %vm759_vm1, 0.0, %v807_v20  ;;  %v810_v29 = vsel %vm759_vm1, 0.0, %v809_v21 }
 0x166   : > { %v930_v30 = vsel %vm759_vm1, 0.0, %v929_v22  ;;  %v811_v32 = vrot.slane %v802_v25, 4  ;;  %v813_v33 = vrot.slane %v806_v19, 4  ;;  %v815_v34 = vsel %vm759_vm1, %v809_v21, %v790_v11 }
 0x167   : > { %v940_v35 = vrot.slane %v930_v30, 4  ;;  %v952_v36 = vsel %vm759_vm1, %v951_v27, %v932_v16  ;;  %v819_v37 = vperm.slane %v815_v34, %v2569_v31  ;;  %v820_v38 = vrot.slane %v810_v29, 4 }
 0x168   : > { %v812_v39 = vsel %vm759_vm1, 0.0, %v811_v32  ;;  %v814_v40 = vsel %vm759_vm1, 0.0, %v813_v33  ;;  %v826_v41 = vsel %vm759_vm1, %v813_v33, %v802_v25  ;;  %v928_v42 = vsel %vm759_vm1, 0.0, %v927_v15 }
 0x169   : > { %v821_v43 = vsel %vm759_vm1, %v820_v38, %v808_v28  ;;  %v830_v45 = vperm.slane %v826_v41, %v2569_v31  ;;  %v831_v46 = vrot.slane %v814_v40, 4  ;;  %v839_v47 = vrot.slane %v819_v37, 4 }
 0x16a   : > { %v825_v48 = vperm.slane %v821_v43, %v2569_v31  ;;  %v935_v49 = vsel %vm759_vm1, %v929_v22, %v910_v6  ;;  %v941_v50 = vsel %vm759_vm1, %v940_v35, %v928_v42  ;;  %v956_v51 = vperm.slane %v952_v36, %v2569_v31 }
 0x16b   : > { %v832_v52 = vsel %vm759_vm1, %v831_v46, %v812_v39  ;;  %v939_v53 = vperm.slane %v935_v49, %v2569_v31  ;;  %v945_v54 = vperm.slane %v941_v50, %v2569_v31  ;;  %v971_v55 = vrot.slane %v950_v26, 4 }
 0x16c   : > { %v969_v56 = vrot.slane %v956_v51, 4  ;;  %v836_v57 = vperm.slane %v832_v52, %v2569_v31  ;;  %v851_v58 = vrot.slane %v830_v45, 4  ;;  %v840_v62 = vsel %vm759_vm1, %v825_v48, %v839_v47  ;;  %v1117_v47 = vld [vmem:[%s554_s1] sm:$0xff] }
 0x16d   : > { %v959_v59 = vrot.slane %v939_v53, 4  ;;  %v972_v60 = vsel %vm759_vm1, %v956_v51, %v971_v55  ;;  %v957_v61 = vrot.slane %v945_v54, 4  ;;  %v837_v2 = vrot.slane %v825_v48, 4 }
 0x16e   : > { %v980_v63 = vperm.slane %v972_v60, %v2578_v44  ;;  %v970_v0 = vsel %vm759_vm1, %v969_v56, %v950_v26  ;;  %v852_v1 = vsel %vm759_vm1, %v836_v57, %v851_v58  ;;  %v848_v12 = vperm.slane %v840_v62, %v2578_v44 }
 0x16f   : > { %v960_v3 = vsel %vm759_vm1, %v945_v54, %v959_v59  ;;  %v958_v4 = vsel %vm759_vm1, %v957_v61, %v939_v53  ;;  %v976_v5 = vperm.slane %v970_v0, %v2578_v44  ;;  %v860_v6 = vperm.slane %v852_v1, %v2578_v44 }
 0x170   : > { %v968_v7 = vperm.slane %v960_v3, %v2578_v44  ;;  %v985_v8 = vrot.slane %v980_v63, 4  ;;  %v964_v9 = vperm.slane %v958_v4, %v2578_v44  ;;  %v838_v10 = vsel %vm759_vm1, %v837_v2, %v819_v37  ;;  %v1906_v2 = vld [vmem:[%s2834_s9] ss:$0 sm:$0xff] }
 0x171   : > { %v981_v11 = vrot.slane %v976_v5, 4  ;;  %v849_v13 = vrot.slane %v836_v57, 4  ;;  %v844_v17 = vperm.slane %v838_v10, %v2578_v44  ;;  %v865_v24 = vrot.slane %v860_v6, 4 }
 0x172   : > { %v986_v14 = vsel %vm759_vm1, %v985_v8, %v968_v7  ;;  %v987_v15 = vrot.slane %v968_v7, 4  ;;  %v983_v16 = vrot.slane %v964_v9, 4  ;;  %v867_v32 = vrot.slane %v848_v12, 4 }
 0x173   : > { %v1115_v18 = vpack.c.bf16 %v986_v14, %v986_v14  ;;  %v982_v19 = vsel %vm759_vm1, %v981_v11, %v964_v9  ;;  %v850_v20 = vsel %vm759_vm1, %v849_v13, %v830_v45  ;;  %v863_v30 = vrot.slane %v844_v17, 4  ;;  %v744_v45 = vpop.f32.mrf.mxu2 }
 0x174   : > { %v1113_v21 = vpack.c.bf16 %v982_v19, %v982_v19  ;;  %v988_v22 = vsel %vm759_vm1, %v980_v63, %v987_v15  ;;  %v984_v23 = vsel %vm759_vm1, %v976_v5, %v983_v16  ;;  %v856_v28 = vperm.slane %v850_v20, %v2578_v44 }
 0x175   : > { %v1163_v25 = vsel %vm1120_vm2, %v1115_v18, 0  ;;  %v1116_v26 = vpack.c.bf16 %v988_v22, %v988_v22  ;;  %v1114_v27 = vpack.c.bf16 %v984_v23, %v984_v23  ;;  %v866_v36 = vsel %vm759_vm1, %v865_v24, %v848_v12 }
 0x176   : > { %1172 = vmatpush.bf16.xpose.msrb.mxu1 %v1163_v25  ;;  %v1125_v29 = vsel %vm1120_vm2, %v1113_v21, 0  ;;  %v861_v35 = vrot.slane %v856_v28, 4  ;;  %v868_v38 = vsel %vm759_vm1, %v860_v6, %v867_v32  ;;  %v864_v39 = vsel %vm759_vm1, %v856_v28, %v863_v30 }
 0x177   : > { %1134 = vmatpush.bf16.xpose.msra.mxu3 %v1125_v29  ;;  %v1182_v33 = vsel %vm1120_vm2, %v1116_v26, 0  ;;  %v1144_v34 = vsel %vm1120_vm2, %v1114_v27, 0  ;;  %v1111_v40 = vpack.c.bf16 %v866_v36, %v866_v36  ;;  %v1112_v42 = vpack.c.bf16 %v868_v38, %v868_v38 }
 0x178   : > { %1191 = vmatpush.bf16.xpose.msrb.mxu2 %v1182_v33  ;;  %1153 = vmatpush.bf16.xpose.msrb.mxu0 %v1144_v34  ;;  %v862_v37 = vsel %vm759_vm1, %v861_v35, %v844_v17  ;;  %v1110_v43 = vpack.c.bf16 %v864_v39, %v864_v39  ;;  %vm1118_vm3 = vcmp.gt.f32.partialorder %v1117_v47, 0.5  ;;  %v2279_v48 = vmov 0.0  }
 0x179   : > { %v1109_v41 = vpack.c.bf16 %v862_v37, %v862_v37  ;;  %v1119_v49 = vsel %vm1118_vm3, -1e+09, %v2279_v48  ;;  %v745_v3 = vadd.f32 %v1906_v2, %v744_v45 }
 0x17b   : > { %v746_v46 = vpop.f32.mrf.mxu2  ;;  %v1001_v32 = vrot.slane %v745_v3, 4 }
 0x17d   : > { %1748 = vmatmul.msk.bf16.vlgmr.msrb.gmra.mxu1 %vm1120_vm2, %v1111_v40 }
 0x17e   : > { %1746 = vmatmul.msk.bf16.vlgmr.msra.gmra.mxu3 %vm1120_vm2, %v1109_v41 }
 0x17f   : > { %1749 = vmatmul.msk.bf16.vlgmr.msrb.gmra.mxu2 %vm1120_vm2, %v1112_v42  ;;  %1747 = vmatmul.msk.bf16.vlgmr.msrb.gmra.mxu0 %vm1120_vm2, %v1110_v43 }
 0x1fa   : > { %v1174_v50 = vpop.f32.mrf.mxu1 }
 0x1fb   : > { %v1175_v51 = vadd.f32 %v1174_v50, %v1119_v49 }
 0x1fc   : > { %v1155_v52 = vpop.f32.mrf.mxu0 }
 0x1fd   : > { %v1203_v53 = vsel %vm1120_vm2, %v1175_v51, -inf  ;;  %v1156_v54 = vadd.f32 %v1155_v52, %v1119_v49 }
 0x1fe   : > { %1204 = vmax.xlane.f32.xlu2 %v1203_v53 }
 0x1ff   : > { %v1200_v63 = vsel %vm1120_vm2, %v1156_v54, -inf }
 0x201   : > { %v1136_v55 = vpop.f32.mrf.mxu3 }
 0x202   : > { %v1137_v56 = vadd.f32 %v1136_v55, %v1119_v49  ;;  %v1176_v57 = vpop.f32.mrf.mxu1  ;;  %v1193_v58 = vpop.f32.mrf.mxu2 }
 0x203   : > { %v1194_v59 = vadd.f32 %v1193_v58, %v1119_v49 }
 0x204   : > { %v1157_v60 = vpop.f32.mrf.mxu0  ;;  %v1197_v61 = vsel %vm1120_vm2, %v1137_v56, -inf }
 0x205   : > { %v1206_v62 = vsel %vm1120_vm2, %v1194_v59, -inf  ;;  %1198 = vmax.xlane.f32.xlu0 %v1197_v61 }
 0x206   : > { %1207 = vmax.xlane.f32.xlu1 %v1206_v62  ;;  %1201 = vmax.xlane.f32.xlu2 %v1200_v63 }
 0x209   : > { %v1138_v0 = vpop.f32.mrf.mxu3 }
 0x20a   : > { %v1195_v1 = vpop.f32.mrf.mxu2 }
 0x219   : > { %990 = vrot.lane.b32.xlu0 %v745_v3, %s2275_s30  ;;  %s1492_s30 = scalar_lea.sflag [#allocation4], %s2516_s8 }
 0x21e   : > { %996 = vrot.lane.b32.xlu2 %v745_v3, %s2274_s4  ;;  %s1507_s4 = sshll.u32 %s1503_s17, 4  ;;  %s1508_s4 = int_to_ptr.hbm [resolvable:$true] %s1507_s4 }
 0x21f   : > { %993 = vrot.lane.b32.xlu1 %v745_v3, %s2276_s28  ;;  %s2178_s28 = sshra.s32 %s1508_s4, 4  ;;  %s2179_s28 = int_to_ptr.hbm [resolvable:$true] %s2178_s28 }
 0x220   : > { %s2180_s21 = scalar_lea.hbm %s2179_s28, 8  ;;  %p2185_p8 = scmp.lt.s32.totalorder %s2179_s28, %s2881_s14 }
 0x221   : > { %p2181_p1 = scmp.ne.s32.totalorder %s2179_s28, %s2180_s21  ;;  %p2186_p10 = scmp.lt.s32.totalorder %s2184_s25, %s2180_s21 }
 0x223   : > { %p2182_p2 = pnand %p2181_p1, %p2437_p7  ;;  %p2187_p13 = por %p2186_p10, %p2185_p8 }
 0x225   : > { %p2183_p4 = pneg %p2182_p2 }
 0x227   : > { %p2188_p0 = pnand %p2187_p13, %p2183_p4 }
 0x271   : > { %v1205_v4 = vpop.xlane.xlu2 %1204 }
 0x272   : > { %v1211_v5 = vsub.f32 %v1175_v51, %v1205_v4 }
 0x274   : > { %v1217_v6 = vmul.f32 1.442695, %v1211_v5 }
 0x276   : > { %1908 = vpow2.f32 %v1217_v6 }
 0x278   : > { %v1199_v7 = vpop.xlane.xlu0 %1198 }
 0x279   : > { %v1208_v8 = vpop.xlane.xlu1 %1207  ;;  %v1202_v9 = vpop.xlane.xlu2 %1201  ;;  %v1209_v10 = vsub.f32 %v1137_v56, %v1199_v7 }
 0x27a   : > { %v1212_v11 = vsub.f32 %v1194_v59, %v1208_v8  ;;  %v1210_v12 = vsub.f32 %v1156_v54, %v1202_v9 }
 0x27b   : > { %v1213_v13 = vmul.f32 1.442695, %v1209_v10 }
 0x27c   : > { %v2672_v14 = vpop.eup %1908  ;;  %v1219_v15 = vmul.f32 1.442695, %v1212_v11  ;;  %v1215_v17 = vmul.f32 1.442695, %v1210_v12 }
 0x27d   : > { %1910 = vpow2.f32 %v1213_v13  ;;  %v1227_v16 = vsel %vm1120_vm2, %v2672_v14, 0.0 }
 0x27e   : > { %1912 = vpow2.f32 %v1219_v15  ;;  %1228 = vadd.xlane.f32.xlu2 %v1227_v16 }
 0x27f   : > { %1914 = vpow2.f32 %v1215_v17 }
 0x281   : > { %v997_v23 = vpop.permute.xlu2 %996 }
 0x282   : > { %v1011_v25 = vrot.slane %v997_v23, 4 }
 0x283   : > { %v2676_v18 = vpop.eup %1910 }
 0x284   : > { %v2678_v19 = vpop.eup %1912  ;;  %v1221_v20 = vsel %vm1120_vm2, %v2676_v18, 0.0 }
 0x285   : > { %v1230_v21 = vsel %vm1120_vm2, %v2678_v19, 0.0  ;;  %1222 = vadd.xlane.f32.xlu0 %v1221_v20  ;;  %v2684_v22 = vpop.eup %1914 }
 0x286   : > { %1231 = vadd.xlane.f32.xlu1 %v1230_v21  ;;  %v1224_v27 = vsel %vm1120_vm2, %v2684_v22, 0.0 }
 0x28b   : > { %v991_v24 = vpop.permute.xlu0 %990 }
 0x28c   : > { %v1013_v26 = vrot.slane %v991_v24, 4  ;;  %v1012_v28 = vsel %vm759_vm1, %v1011_v25, %v991_v24 }
 0x28d   : > { %1225 = vadd.xlane.f32.xlu0 %v1224_v27  ;;  %v1018_v33 = vperm.slane %v1012_v28, %v2569_v31 }
 0x28e   : > { %v1014_v29 = vsel %vm759_vm1, %v997_v23, %v1013_v26 }
 0x28f   : > { %v1022_v30 = vperm.slane %v1014_v29, %v2569_v31  ;;  %v1023_v40 = vrot.slane %v1018_v33, 4 }
 0x291   : > { %v1035_v34 = vrot.slane %v1022_v30, 4  ;;  %v994_v35 = vpop.permute.xlu1 %993 }
 0x292   : > { %v999_v36 = vrot.slane %v994_v35, 4  ;;  %v1002_v37 = vsel %vm759_vm1, %v994_v35, %v1001_v32 }
 0x293   : > { %v1010_v38 = vperm.slane %v1002_v37, %v2569_v31 }
 0x294   : > { %v1000_v39 = vsel %vm759_vm1, %v999_v36, %v745_v3 }
 0x295   : > { %v1006_v41 = vperm.slane %v1000_v39, %v2569_v31  ;;  %v1036_v42 = vsel %vm759_vm1, %v1035_v34, %v1010_v38  ;;  %v1037_v43 = vrot.slane %v1010_v38, 4 }
 0x296   : > { %v1042_v45 = vperm.slane %v1036_v42, %v2578_v44 }
 0x297   : > { %v1024_v46 = vsel %vm759_vm1, %v1023_v40, %v1006_v41  ;;  %v1025_v47 = vrot.slane %v1006_v41, 4  ;;  %v1038_v48 = vsel %vm759_vm1, %v1022_v30, %v1037_v43 }
 0x298   : > { %v1030_v49 = vperm.slane %v1024_v46, %v2578_v44  ;;  %v1046_v50 = vperm.slane %v1038_v48, %v2578_v44  ;;  %v1051_v53 = vrot.slane %v1042_v45, 4 }
 0x299   : > { %v1026_v51 = vsel %vm759_vm1, %v1018_v33, %v1025_v47 }
 0x29a   : > { %v1034_v52 = vperm.slane %v1026_v51, %v2578_v44  ;;  %v1053_v54 = vrot.slane %v1046_v50, 4  ;;  %v1047_v55 = vrot.slane %v1030_v49, 4  ;;  %v1052_v62 = vsel %vm759_vm1, 0.0, %v1051_v53 }
 0x29c   : > { %v1049_v56 = vrot.slane %v1034_v52, 4  ;;  %v1054_v57 = vsel %vm759_vm1, 0.0, %v1053_v54  ;;  %v1066_v58 = vsel %vm759_vm1, %v1053_v54, %v1042_v45  ;;  %v1048_v4 = vsel %vm759_vm1, 0.0, %v1047_v55 }
 0x29d   : > { %v1070_v59 = vperm.slane %v1066_v58, %v2569_v31  ;;  %v1071_v60 = vrot.slane %v1054_v57, 4 }
 0x29e   : > { %v1050_v61 = vsel %vm759_vm1, 0.0, %v1049_v56  ;;  %v1055_v63 = vsel %vm759_vm1, %v1049_v56, %v1030_v49 }
 0x29f   : > { %v1060_v0 = vrot.slane %v1050_v61, 4  ;;  %v1072_v1 = vsel %vm759_vm1, %v1071_v60, %v1052_v62  ;;  %v1091_v2 = vrot.slane %v1070_v59, 4  ;;  %v1059_v3 = vperm.slane %v1055_v63, %v2569_v31 }
 0x2a0   : > { %v1076_v5 = vperm.slane %v1072_v1, %v2569_v31 }
 0x2a1   : > { %v1061_v6 = vsel %vm759_vm1, %v1060_v0, %v1048_v4  ;;  %v1079_v7 = vrot.slane %v1059_v3, 4 }
 0x2a2   : > { %v1065_v8 = vperm.slane %v1061_v6, %v2569_v31  ;;  %v1092_v9 = vsel %vm759_vm1, %v1076_v5, %v1091_v2  ;;  %v1089_v10 = vrot.slane %v1076_v5, 4 }
 0x2a3   : > { %v1100_v11 = vperm.slane %v1092_v9, %v2578_v44 }
 0x2a4   : > { %v1080_v12 = vsel %vm759_vm1, %v1065_v8, %v1079_v7  ;;  %v1077_v13 = vrot.slane %v1065_v8, 4  ;;  %v1090_v15 = vsel %vm759_vm1, %v1089_v10, %v1070_v59 }
 0x2a5   : > { %v1088_v16 = vperm.slane %v1080_v12, %v2578_v44  ;;  %v1105_v17 = vrot.slane %v1100_v11, 4  ;;  %v1096_v20 = vperm.slane %v1090_v15, %v2578_v44 }
 0x2a6   : > { %v1078_v21 = vsel %vm759_vm1, %v1077_v13, %v1059_v3 }
 0x2a7   : > { %v1106_v23 = vsel %vm759_vm1, %v1105_v17, %v1088_v16  ;;  %v1084_v24 = vperm.slane %v1078_v21, %v2578_v44  ;;  %v1101_v25 = vrot.slane %v1096_v20, 4  ;;  %v1107_v26 = vrot.slane %v1088_v16, 4 }
 0x2a8   : > { %v1247_v27 = vpack.c.bf16 %v1106_v23, %v1106_v23 }
 0x2a9   : > { %v1102_v28 = vsel %vm759_vm1, %v1101_v25, %v1084_v24  ;;  %v1103_v29 = vrot.slane %v1084_v24, 4  ;;  %v1108_v30 = vsel %vm759_vm1, %v1100_v11, %v1107_v26 }
 0x2aa   : > { %v1292_v32 = vsel %vm1252_vm4, %v1247_v27, 0  ;;  %v1245_v33 = vpack.c.bf16 %v1102_v28, %v1102_v28  ;;  %v1248_v34 = vpack.c.bf16 %v1108_v30, %v1108_v30 }
 0x2ab   : > { %1301 = vmatpush.bf16.msra.mxu1 %v1292_v32  ;;  %v1104_v35 = vsel %vm759_vm1, %v1096_v20, %v1103_v29 }
 0x2ac   : > { %v1254_v36 = vsel %vm1252_vm4, %v1245_v33, 0  ;;  %v1311_v37 = vsel %vm1252_vm4, %v1248_v34, 0  ;;  %v1246_v38 = vpack.c.bf16 %v1104_v35, %v1104_v35 }
 0x2ad   : > { %1263 = vmatpush.bf16.msrb.mxu3 %v1254_v36  ;;  %1320 = vmatpush.bf16.msra.mxu2 %v1311_v37 }
 0x2ae   : > { %v1273_v39 = vsel %vm1252_vm4, %v1246_v38, 0 }
 0x2af   : > { %1282 = vmatpush.bf16.msra.mxu0 %v1273_v39 }
 0x2f1   : > { %v1229_v40 = vpop.xlane.xlu2 %1228 }
 0x2f2   : > { %1916 = vrcp.f32 %v1229_v40 }
 0x2f8   : > { %v1917_v41 = vpop.eup %1916  ;;  %v1223_v42 = vpop.xlane.xlu0 %1222 }
 0x2f9   : > { %v1239_v43 = vmul.f32 %v1917_v41, %v2672_v14  ;;  %v1232_v45 = vpop.xlane.xlu1 %1231  ;;  %1918 = vrcp.f32 %v1223_v42 }
 0x2fa   : > { %1920 = vrcp.f32 %v1232_v45 }
 0x2fb   : > { %v1243_v46 = vpack.c.bf16 %v1239_v43, %v1239_v43 }
 0x2fd   : > { %1752 = vmatmul.msk.bf16.vlgmr.msra.gmra.mxu1 %vm1120_vm2, %v1243_v46 }
 0x2ff   : > { %v1919_v47 = vpop.eup %1918 }
 0x300   : > { %v1921_v48 = vpop.eup %1920  ;;  %v1237_v49 = vmul.f32 %v1919_v47, %v2676_v18  ;;  %v1226_v50 = vpop.xlane.xlu0 %1225 }
 0x301   : > { %v1240_v51 = vmul.f32 %v1921_v48, %v2678_v19  ;;  %1922 = vrcp.f32 %v1226_v50 }
 0x302   : > { %v1241_v52 = vpack.c.bf16 %v1237_v49, %v1237_v49 }
 0x303   : > { %v1244_v53 = vpack.c.bf16 %v1240_v51, %v1240_v51 }
 0x304   : > { %1750 = vmatmul.msk.bf16.vlgmr.msrb.gmra.mxu3 %vm1120_vm2, %v1241_v52 }
 0x305   : > { %1753 = vmatmul.msk.bf16.vlgmr.msra.gmra.mxu2 %vm1120_vm2, %v1244_v53 }
 0x307   : > { %v1923_v14 = vpop.eup %1922 }
 0x308   : > { %v1238_v54 = vmul.f32 %v1923_v14, %v2684_v22 }
 0x30a   : > { %v1242_v55 = vpack.c.bf16 %v1238_v54, %v1238_v54 }
 0x30c   : > { %1751 = vmatmul.msk.bf16.vlgmr.msra.gmra.mxu0 %vm1120_vm2, %v1242_v55 }
 0x37a   : > { %v1303_v56 = vpop.f32.mrf.mxu1 }
 0x37b   : > { %v1326_v58 = vrot.slane %v1303_v56, 4 }
 0x382   : > { %v1305_v57 = vpop.f32.mrf.mxu1 }
 0x387   : > { %v1265_v18 = vpop.f32.mrf.mxu3 }
 0x388   : > { %v1327_v59 = vsel %vm759_vm1, %v1326_v58, %v1265_v18  ;;  %v1328_v19 = vrot.slane %v1265_v18, 4  ;;  %v1322_v60 = vpop.f32.mrf.mxu2 }
 0x389   : > { %v1333_v61 = vperm.slane %v1327_v59, %v2569_v31  ;;  %v1338_v62 = vrot.slane %v1322_v60, 4  ;;  %v1284_v63 = vpop.f32.mrf.mxu0 }
 0x38a   : > { %v1329_v0 = vsel %vm759_vm1, %v1303_v56, %v1328_v19  ;;  %v1340_v1 = vrot.slane %v1284_v63, 4 }
 0x38b   : > { %v1337_v22 = vperm.slane %v1329_v0, %v2569_v31  ;;  %v1352_v2 = vrot.slane %v1333_v61, 4  ;;  %v1339_v3 = vsel %vm759_vm1, %v1338_v62, %v1284_v63 }
 0x38c   : > { %v1341_v4 = vsel %vm759_vm1, %v1322_v60, %v1340_v1  ;;  %v1345_v5 = vperm.slane %v1339_v3, %v2569_v31 }
 0x38d   : > { %v1364_v6 = vrot.slane %v1337_v22, 4  ;;  %v1349_v7 = vperm.slane %v1341_v4, %v2569_v31  ;;  %v1907_v4 = vld [vmem:[%s2883_s27] ss:$0 sm:$0xff] }
 0x38e   : > { %v1350_v8 = vrot.slane %v1345_v5, 4  ;;  %v1353_v9 = vsel %vm759_vm1, %v1345_v5, %v1352_v2 }
 0x38f   : > { %v1361_v10 = vperm.slane %v1353_v9, %v2578_v44  ;;  %v1362_v11 = vrot.slane %v1349_v7, 4  ;;  %v1365_v12 = vsel %vm759_vm1, %v1349_v7, %v1364_v6  ;;  %v1267_v13 = vpop.f32.mrf.mxu3 }
 0x390   : > { %v1351_v15 = vsel %vm759_vm1, %v1350_v8, %v1333_v61  ;;  %v1373_v16 = vperm.slane %v1365_v12, %v2578_v44  ;;  %v1324_v17 = vpop.f32.mrf.mxu2  ;;  %v1774_v61 = vld [vmem:[#allocation14 + $0x8] sm:$0xff] }
 0x391   : > { %v1357_v20 = vperm.slane %v1351_v15, %v2578_v44  ;;  %v1363_v21 = vsel %vm759_vm1, %v1362_v11, %v1337_v22  ;;  %v1376_v23 = vrot.slane %v1361_v10, 4  ;;  %v1286_v24 = vpop.f32.mrf.mxu0  ;;  %1483 = vmatpush.bf16.msra.mxu3 %v1774_v61 }
 0x392   : > { %v1369_v25 = vperm.slane %v1363_v21, %v2578_v44  ;;  %v1380_v26 = vrot.slane %v1373_v16, 4 }
 0x393   : > { %v1374_v27 = vrot.slane %v1357_v20, 4  ;;  %v1377_v28 = vsel %vm759_vm1, 0.0, %v1376_v23  ;;  %v1382_v29 = vsel %vm759_vm1, %v1376_v23, %v1357_v20 }
 0x394   : > { %v1378_v30 = vrot.slane %v1369_v25, 4  ;;  %v1381_v32 = vsel %vm759_vm1, 0.0, %v1380_v26  ;;  %v1386_v33 = vperm.slane %v1382_v29, %v2569_v31  ;;  %v1387_v34 = vrot.slane %v1377_v28, 4 }
 0x395   : > { %v1375_v35 = vsel %vm759_vm1, 0.0, %v1374_v27  ;;  %v1398_v36 = vrot.slane %v1381_v32, 4  ;;  %v1393_v37 = vsel %vm759_vm1, %v1380_v26, %v1369_v25 }
 0x396   : > { %v1379_v38 = vsel %vm759_vm1, 0.0, %v1378_v30  ;;  %v1388_v39 = vsel %vm759_vm1, %v1387_v34, %v1375_v35  ;;  %v1397_v40 = vperm.slane %v1393_v37, %v2569_v31  ;;  %v1406_v41 = vrot.slane %v1386_v33, 4 }
 0x397   : > { %v1392_v42 = vperm.slane %v1388_v39, %v2569_v31  ;;  %v1399_v43 = vsel %vm759_vm1, %v1398_v36, %v1379_v38 }
 0x398   : > { %v1403_v45 = vperm.slane %v1399_v43, %v2569_v31  ;;  %v1418_v46 = vrot.slane %v1397_v40, 4 }
 0x399   : > { %v1407_v47 = vsel %vm759_vm1, %v1392_v42, %v1406_v41  ;;  %v1404_v48 = vrot.slane %v1392_v42, 4 }
 0x39a   : > { %v1415_v49 = vperm.slane %v1407_v47, %v2578_v44  ;;  %v1419_v50 = vsel %vm759_vm1, %v1403_v45, %v1418_v46  ;;  %v1416_v51 = vrot.slane %v1403_v45, 4 }
 0x39b   : > { %v1427_v52 = vperm.slane %v1419_v50, %v2578_v44  ;;  %v1405_v53 = vsel %vm759_vm1, %v1404_v48, %v1386_v33 }
 0x39c   : > { %v1434_v14 = vrot.slane %v1415_v49, 4  ;;  %v1411_v54 = vperm.slane %v1405_v53, %v2578_v44  ;;  %v1417_v55 = vsel %vm759_vm1, %v1416_v51, %v1397_v40 }
 0x39d   : > { %v1432_v56 = vrot.slane %v1427_v52, 4  ;;  %v1423_v31 = vperm.slane %v1417_v55, %v2578_v44  ;;  %v1773_v44 = vld [vmem:[#allocation14] sm:$0xff] }
 0x39e   : > { %v1435_v57 = vsel %vm759_vm1, %v1427_v52, %v1434_v14  ;;  %v1430_v58 = vrot.slane %v1411_v54, 4  ;;  %1484 = vmatpush.bf16.msra.mxu3 %v1773_v44 }
 0x39f   : > { %1445 = vrot.lane.b32.xlu2 %v1435_v57, %s2280_s11  ;;  %v1433_v18 = vsel %vm759_vm1, %v1432_v56, %v1415_v49  ;;  %v1428_v59 = vrot.slane %v1423_v31, 4 }
 0x3a0   : > { %1441 = vrot.lane.b32.xlu0 %v1433_v18, %s2281_s15  ;;  %v1431_v19 = vsel %vm759_vm1, %v1423_v31, %v1430_v58 }
 0x3a1   : > { %1437 = vrot.lane.b32.xlu1 %v1431_v19, %s2282_s12  ;;  %v1429_v60 = vsel %vm759_vm1, %v1428_v59, %v1411_v54 }
 0x3f9   : > { %v1446_v1 = vpop.permute.xlu2 %1445 }
 0x412   : > { %v1442_v62 = vpop.permute.xlu0 %1441 }
 0x413   : > { %v1438_v63 = vpop.permute.xlu1 %1437 }
 0x414   : > { %v1448_v0 = vsel %vm1120_vm2, %v1429_v60, %v1438_v63 }
 0x415   : > { %v1450_v22 = vsel %vm1449_vm5, %v1448_v0, %v1442_v62 }
 0x416   : > { %v1452_v2 = vsel %vm1451_vm6, %v1450_v22, %v1446_v1 }
 0x417   : > { %v1453_v3 = vpack.c.bf16 %v1452_v2, %v1452_v2 }
 0x419   : > { %1762 = vmatmul.msk.bf16.vlgmr.msra.gmra.mxu3 %vm658_vm0, %v1453_v3 }
 0x49c   : > { %v1486_v5 = vpop.f32.mrf.mxu3 }
 0x49d   : > { %v1487_v6 = vadd.f32 %v1907_v4, %v1486_v5 }
 0x49f   : > { %1490 = vst.msk [vmem:[%s630_s6] sm:$0xff] %vm658_vm0, %v1487_v6 }
 0x4a0   : > { %2191 = shalt.err (!%p2188_p0)
}
 0x4a1   : > { %1799 = dma.vmem_to_hbm [thread:$0]  (%p2437_p7), %s1506_s24, 128, %s1508_s4, %s1492_s30  }
 0x4a4   : > { %v1488_v7 = vpop.f32.mrf.mxu3 }
 0x4a5 PF: > { %s2884_s8 = sld [smem:[#allocation24_spill]]  ;;  %p1828_p3 = pnand %p1700_p11, %p2393_p6 }
 0x4a7   : > { %p1829_p5 = pneg %p1828_p3 }
 0x4ab   : > { %s1519_s13 = sand.u32 1, %s2884_s8  }
 0x4ac   : > { %s1520_s0 = scalar_lea.sflag [#allocation4], %s1519_s13 }
 0x4ad   : > { %2241 = dma.done.wait (%p1829_p5), %s1520_s0, 128  }
 0x4ae   : > { %2243 = vsyncadd (%p1829_p5), %s1520_s0, 4294967168  ;;  %s36_s26 = sadd.s32 1, %s2266_s26   ;;  %s2886_s16 = sld [smem:[#allocation30_spill]] }
 0x4af   : > { %p33_p9 = scmp.ge.s32.totalorder %s36_s26, 4   ;;  %s2887_s24 = sld [smem:[#allocation26_spill]] }
 0x4b0   : > { %s2888_s25 = sld [smem:[#allocation28_spill]]  ;;  %s2889_s21 = smov %s2250_s22 }
 0x4b1   : > { %s2890_s22 = smov %s2254_s23  ;;  %35 = sbr.rel (!%p33_p9) target bundleno = 20 (0x14), region = 166 }
 0x4b4   : > { %s2891_s23 = smov %s2886_s16 }
 0x4b6   :  { %1526 = vsyncpa [#allocation3], 1 }
 0x4b7   :  { %1528 = vsyncpa [#allocation3 + $0x1], 1 }
 0x4b8   :  { %1529 = vsyncpa [#allocation6], 1 }
 0x4b9   :  { %1531 = vsyncpa [#allocation6 + $0x1], 1 }
 0x4ba   :  { %1532 = vsyncpa [#allocation9], 1 }
 0x4bb   :  { %1534 = vsyncpa [#allocation9 + $0x1], 1 }
 0x4bc   :  { %1535 = vsyncpa [#allocation12], 1 }
 0x4bd   :  { %1536 = vsyncpa [#allocation15], 1 }
 0x4be   :  { %1537 = vsyncpa [#allocation4], 1 }
 0x4bf   :  { %1539 = vsyncpa [#allocation4 + $0x1], 1 }

</bundles_post_ra>
